<compile_context>
chip_gen: v6e
topology: v6e:2x2x1
jax: 0.10.0
libtpu: 0.0.40
codegen_flags: <defaults>
</compile_context>

<pallas_src>
import jax
import jax.numpy as jnp
import numpy as np
from jax import lax
from jax.experimental import pallas as pl
from jax.experimental.pallas import tpu as pltpu

# Small synthetic config consistent with the module.
B = 2              # batch
S = 8              # original sequence length
P = 4              # prompt_length
H = 32             # hidden_size
V = 64             # vocab size of the (synthetic) input embedding table
L = 1 + P + S      # [MASK] slot + prompt + sequence = 13

LPAD = 128                       # lane-dense width for the small int outputs
HPAD = 128                       # lane-dense hidden (H=32 padded; >=128 in prod)
VE = V + P                       # vocab rows + prompt rows
VE_PAD = ((VE + 7) // 8) * 8     # sublane-aligned extended-table rows
NROWS = 8                        # int-slab rows (4 used, padded to 8 sublanes)


def _preprocess_kernel(table_ref, ids_ref, attn_ref, tt_ref, lab_ref,
                       embeds_out, ints_out):
    # ---- 1. embedding gather: one-hot MXU matmul against the VMEM-resident
    #         extended table [vocab rows ; prompt rows] -> one dense store. ----
    ids = ids_ref[...]                                             # (B*L, 1) i32
    vlane = lax.broadcasted_iota(jnp.int32, (1, VE_PAD), 1)        # (1, VE_PAD)
    onehot = (ids == vlane).astype(jnp.float32)                    # (B*L, VE_PAD)
    embeds_out[...] = jnp.dot(onehot, table_ref[...],
                              preferred_element_type=jnp.float32)  # (B*L, HPAD)

    # ---- 2. attention_mask / token_type / position_ids / labels assembled as
    #         one lane-dense (B, 8, 128) int32 slab -> one unmasked store. ----
    lane = lax.broadcasted_iota(jnp.int32, (1, LPAD), 1)           # (1, LPAD)
    in_prefix = lane <= P                                          # [MASK]+prompt

    attn_tok = attn_ref[...]       # (B, LPAD) f32, seq entries at lanes P+1..L-1
    tt_tok = tt_ref[...]           # (B, LPAD) i32, same layout
    real_len = jnp.sum(attn_tok, axis=-1, keepdims=True).astype(jnp.int32)

    attn_row = jnp.where(in_prefix, jnp.float32(1.0), attn_tok)    # (B, LPAD) f32
    tt_row = jnp.where(in_prefix, 1, tt_tok)                       # (B, LPAD) i32
    pos_row = jnp.where(in_prefix, lane + real_len, lane - (P + 1))
    lab_row = jnp.where(lane == 0, lab_ref[...], -100)             # (B, LPAD) i32

    attn_bits = pltpu.bitcast(attn_row, jnp.int32)                 # exact f32 bits

    sub = lax.broadcasted_iota(jnp.int32, (1, NROWS, LPAD), 1)     # sublane id
    slab = jnp.where(sub == 0, attn_bits[:, None, :],
           jnp.where(sub == 1, tt_row[:, None, :],
           jnp.where(sub == 2, pos_row[:, None, :],
           jnp.where(sub == 3, lab_row[:, None, :], 0))))
    ints_out[...] = slab                                           # (B, 8, LPAD)


@jax.jit
def deberta_prompt_preprocess(input_ids, emb_table, prompt, attention_mask,
                              token_type_ids, labels):
    # ---- layout / parameter plumbing only (no per-token compute hoisted) ----
    # Extended gather table: vocab rows followed by the learned prompt rows,
    # lane-padded to 128 and sublane-padded to a multiple of 8.
    ext_table = jnp.concatenate([emb_table.astype(jnp.float32),
                                 prompt.astype(jnp.float32)], axis=0)
    ext_table = jnp.pad(ext_table, ((0, VE_PAD - VE), (0, HPAD - H)))

    # Effective gather index for every output position:
    #   pos 0 -> [MASK] row (V-1), pos 1..P -> prompt rows, pos P+1.. -> input_ids
    prefix_ids = jnp.concatenate([jnp.array([V - 1], jnp.int32),
                                  V + jnp.arange(P, dtype=jnp.int32)])
    ids_ext = jnp.concatenate(
        [jnp.broadcast_to(prefix_ids[None], (B, 1 + P)),
         input_ids.astype(jnp.int32)], axis=1).reshape(B * L, 1)

    # Left-pad so the S real entries already sit at lanes P+1 .. L-1 of a
    # 128-lane row (a lax.pad, not a scatter; no in-kernel shuffle needed).
    attn_pad = jnp.pad(attention_mask.astype(jnp.float32),
                       ((0, 0), (1 + P, LPAD - L)))
    tt_pad = jnp.pad(token_type_ids.astype(jnp.int32),
                     ((0, 0), (1 + P, LPAD - L)))
    lab2d = labels.astype(jnp.int32).reshape(B, 1)

    out_shapes = (
        jax.ShapeDtypeStruct((B * L, HPAD), jnp.float32),    # inputs_embeds slab
        jax.ShapeDtypeStruct((B, NROWS, LPAD), jnp.int32),   # attn/tt/pos/labels
    )
    embeds2d, ints = pl.pallas_call(
        _preprocess_kernel,
        out_shape=out_shapes,
        grid=(1,),   # whole B=2 batch in one step: per-batch grid was overhead
        in_specs=[
            pl.BlockSpec((VE_PAD, HPAD), lambda i: (0, 0)),   # extended table
            pl.BlockSpec((B * L, 1), lambda i: (0, 0)),       # gather indices
            pl.BlockSpec((B, LPAD), lambda i: (0, 0)),        # attention_mask
            pl.BlockSpec((B, LPAD), lambda i: (0, 0)),        # token_type_ids
            pl.BlockSpec((B, 1), lambda i: (0, 0)),           # labels
        ],
        out_specs=(
            pl.BlockSpec((B * L, HPAD), lambda i: (0, 0)),
            pl.BlockSpec((B, NROWS, LPAD), lambda i: (0, 0, 0)),
        ),
    )(ext_table, ids_ext, attn_pad, tt_pad, lab2d)

    # Slice the lane-dense slabs back to the module's output shapes.
    inputs_embeds = embeds2d[:, :H].reshape(B, L, H)
    attn = lax.bitcast_convert_type(ints[:, 0, :L], jnp.float32)
    tt = ints[:, 1, :L]
    pos = ints[:, 2, :L]
    lab = ints[:, 3, :L]
    return inputs_embeds, attn, tt, pos, lab


def _reference(input_ids, emb_table, prompt, attention_mask, token_type_ids,
               labels):
    # Pure-JAX re-statement of DebertaForPromptBase.preprocess_data.
    inputs_embeds = emb_table[input_ids]                            # (B, S, H)
    mask_emb = jnp.broadcast_to(emb_table[-1][None, None, :], (B, 1, H))
    prompt_b = jnp.broadcast_to(prompt[None], (B, P, H))
    embeds = jnp.concatenate([mask_emb, prompt_b, inputs_embeds], axis=1)
    real_length = attention_mask.sum(axis=1, keepdims=True)
    position_ids = jnp.broadcast_to(jnp.arange(S)[None], (B, S))
    prompt_pos = jnp.arange(P + 1)[None] + real_length
    pos = jnp.concatenate([prompt_pos, position_ids], axis=1).astype(jnp.int32)
    attn = jnp.concatenate(
        [jnp.ones((B, P + 1), jnp.float32), attention_mask], axis=1)
    tt = jnp.concatenate(
        [jnp.ones((B, P + 1)), token_type_ids.astype(jnp.float32)],
        axis=1).astype(jnp.int32)
    lab = jnp.concatenate(
        [labels[:, None], jnp.full((B, S + P), -100)], axis=1).astype(jnp.int32)
    return embeds, attn, tt, pos, lab


if __name__ == "__main__":
    key = jax.random.PRNGKey(0)
    k_emb, k_ids, k_lab = jax.random.split(key, 3)

    # Deterministic synthetic "pretrained" parameters.
    emb_table = jax.random.normal(k_emb, (V, H), jnp.float32) * 0.02
    # prompt.data[:] = embedding.weight[-1] broadcast to (P, H)
    prompt = jnp.broadcast_to(emb_table[-1][None, :], (P, H)).astype(jnp.float32)

    input_ids = jax.random.randint(k_ids, (B, S), 0, V, jnp.int32)
    # attention_mask: first batch full, second batch padded after 5 tokens.
    attention_mask = jnp.array(
        [[1] * S, [1] * 5 + [0] * (S - 5)], dtype=jnp.float32)
    token_type_ids = jnp.zeros((B, S), jnp.int32)
    labels = jax.random.randint(k_lab, (B,), 0, V, jnp.int32)

    outs = deberta_prompt_preprocess(
        input_ids, emb_table, prompt, attention_mask, token_type_ids, labels)
    outs = jax.block_until_ready(outs)

    refs = _reference(input_ids, emb_table, prompt, attention_mask,
                      token_type_ids, labels)
    for o, r in zip(outs, refs):
        np.testing.assert_allclose(np.asarray(o), np.asarray(r),
                                   rtol=1e-5, atol=1e-5)

    print("KERNEL_OK")
</pallas_src>

<mosaic_0001>
module attributes {stable_mosaic.version = 11 : i64} {
  func.func @_preprocess_kernel(%arg0: i32, %arg1: memref<72x128xf32, #tpu.memory_space<vmem>>, %arg2: memref<26x1xi32, #tpu.memory_space<vmem>>, %arg3: memref<2x128xf32, #tpu.memory_space<vmem>>, %arg4: memref<2x128xi32, #tpu.memory_space<vmem>>, %arg5: memref<2x1xi32, #tpu.memory_space<vmem>>, %arg6: memref<26x128xf32, #tpu.memory_space<vmem>>, %arg7: memref<2x8x128xi32, #tpu.memory_space<vmem>>) attributes {dimension_semantics = [#tpu.dimension_semantics<arbitrary>], iteration_bounds = array<i64: 1>, scalar_prefetch = 0 : i64, scratch_operands = 0 : i64, tpu.core_type = #tpu.core_type<tc>, window_params = [{pipeline_mode = #tpu.pipeline_mode<synchronous>, transform_indices = @transform_0, window_bounds = array<i64: 72, 128>}, {pipeline_mode = #tpu.pipeline_mode<synchronous>, transform_indices = @transform_1, window_bounds = array<i64: 26, 1>}, {pipeline_mode = #tpu.pipeline_mode<synchronous>, transform_indices = @transform_2, window_bounds = array<i64: 2, 128>}, {pipeline_mode = #tpu.pipeline_mode<synchronous>, transform_indices = @transform_3, window_bounds = array<i64: 2, 128>}, {pipeline_mode = #tpu.pipeline_mode<synchronous>, transform_indices = @transform_4, window_bounds = array<i64: 2, 1>}, {pipeline_mode = #tpu.pipeline_mode<synchronous>, transform_indices = @transform_5, window_bounds = array<i64: 26, 128>}, {pipeline_mode = #tpu.pipeline_mode<synchronous>, transform_indices = @transform_6, window_bounds = array<i64: 2, 8, 128>}]} {
    %c0 = arith.constant 0 : index
    %c0_0 = arith.constant 0 : index
    %0 = vector.load %arg2[%c0, %c0_0] : memref<26x1xi32, #tpu.memory_space<vmem>>, vector<26x1xi32>
    %1 = tpu.iota {dimensions = array<i32: 1>} : vector<1x72xi32>
    %2 = vector.broadcast %0 : vector<26x1xi32> to vector<26x72xi32>
    %3 = vector.broadcast %1 : vector<1x72xi32> to vector<26x72xi32>
    %4 = arith.cmpi eq, %2, %3 : vector<26x72xi32>
    %5 = arith.extui %4 : vector<26x72xi1> to vector<26x72xi32>
    %6 = arith.sitofp %5 : vector<26x72xi32> to vector<26x72xf32>
    %c0_1 = arith.constant 0 : index
    %c0_2 = arith.constant 0 : index
    %7 = vector.load %arg1[%c0_1, %c0_2] : memref<72x128xf32, #tpu.memory_space<vmem>>, vector<72x128xf32>
    %cst = arith.constant dense<0.000000e+00> : vector<26x128xf32>
    %8 = tpu.matmul %6, %7, %cst {dimension_numbers = #tpu.dot_dimension_numbers<[1], [0], [0], [1], [0, 0, 1, 1], [], []>} : vector<26x72xf32>, vector<72x128xf32>, vector<26x128xf32> -> vector<26x128xf32>
    %c0_3 = arith.constant 0 : index
    %c0_4 = arith.constant 0 : index
    %9 = vector.load %arg6[%c0_3, %c0_4] : memref<26x128xf32, #tpu.memory_space<vmem>>, vector<26x128xf32>
    tpu.vector_store %arg6[%c0_3, %c0_4], %8 {strides = array<i32>} : memref<26x128xf32, #tpu.memory_space<vmem>>, vector<26x128xf32>,
    %10 = tpu.iota {dimensions = array<i32: 1>} : vector<1x128xi32>
    %c4_i32 = arith.constant 4 : i32
    %11 = vector.broadcast %c4_i32 : i32 to vector<1x128xi32>
    %12 = arith.cmpi sle, %10, %11 : vector<1x128xi32>
    %c0_5 = arith.constant 0 : index
    %c0_6 = arith.constant 0 : index
    %13 = vector.load %arg3[%c0_5, %c0_6] : memref<2x128xf32, #tpu.memory_space<vmem>>, vector<2x128xf32>
    %c0_7 = arith.constant 0 : index
    %c0_8 = arith.constant 0 : index
    %14 = vector.load %arg4[%c0_7, %c0_8] : memref<2x128xi32, #tpu.memory_space<vmem>>, vector<2x128xi32>
    %cst_9 = arith.constant dense<0.000000e+00> : vector<2xf32>
    %15 = vector.multi_reduction <add>, %13, %cst_9 [1] : vector<2x128xf32> to vector<2xf32>
    %16 = vector.shape_cast %15 : vector<2xf32> to vector<2x1xf32>
    %17 = arith.fptosi %16 : vector<2x1xf32> to vector<2x1xi32>
    %cst_10 = arith.constant 1.000000e+00 : f32
    %18 = vector.shape_cast %12 : vector<1x128xi1> to vector<1x128xi1>
    %19 = vector.broadcast %18 : vector<1x128xi1> to vector<2x128xi1>
    %20 = vector.broadcast %cst_10 : f32 to vector<2x128xf32>
    %21 = arith.select %19, %20, %13 : vector<2x128xi1>, vector<2x128xf32>
    %c1_i32 = arith.constant 1 : i32
    %22 = vector.shape_cast %12 : vector<1x128xi1> to vector<1x128xi1>
    %23 = vector.broadcast %22 : vector<1x128xi1> to vector<2x128xi1>
    %24 = vector.broadcast %c1_i32 : i32 to vector<2x128xi32>
    %25 = arith.select %23, %24, %14 : vector<2x128xi1>, vector<2x128xi32>
    %26 = vector.broadcast %10 : vector<1x128xi32> to vector<2x128xi32>
    %27 = vector.broadcast %17 : vector<2x1xi32> to vector<2x128xi32>
    %28 = arith.addi %26, %27 : vector<2x128xi32>
    %c5_i32 = arith.constant 5 : i32
    %29 = vector.broadcast %c5_i32 : i32 to vector<1x128xi32>
    %30 = arith.subi %10, %29 : vector<1x128xi32>
    %31 = vector.shape_cast %12 : vector<1x128xi1> to vector<1x128xi1>
    %32 = vector.broadcast %31 : vector<1x128xi1> to vector<2x128xi1>
    %33 = vector.shape_cast %30 : vector<1x128xi32> to vector<1x128xi32>
    %34 = vector.broadcast %33 : vector<1x128xi32> to vector<2x128xi32>
    %35 = arith.select %32, %28, %34 : vector<2x128xi1>, vector<2x128xi32>
    %c0_i32 = arith.constant 0 : i32
    %36 = vector.broadcast %c0_i32 : i32 to vector<1x128xi32>
    %37 = arith.cmpi eq, %10, %36 : vector<1x128xi32>
    %c0_11 = arith.constant 0 : index
    %c0_12 = arith.constant 0 : index
    %38 = vector.load %arg5[%c0_11, %c0_12] : memref<2x1xi32, #tpu.memory_space<vmem>>, vector<2x1xi32>
    %c-100_i32 = arith.constant -100 : i32
    %39 = vector.shape_cast %37 : vector<1x128xi1> to vector<1x128xi1>
    %40 = vector.broadcast %39 : vector<1x128xi1> to vector<2x128xi1>
    %41 = vector.shape_cast %38 : vector<2x1xi32> to vector<2x1xi32>
    %42 = vector.broadcast %41 : vector<2x1xi32> to vector<2x128xi32>
    %43 = vector.broadcast %c-100_i32 : i32 to vector<2x128xi32>
    %44 = arith.select %40, %42, %43 : vector<2x128xi1>, vector<2x128xi32>
    %45 = tpu.bitcast %21 : vector<2x128xf32> -> vector<2x128xi32>
    %46 = tpu.iota {dimensions = array<i32: 1>} : vector<1x8x128xi32>
    %c0_i32_13 = arith.constant 0 : i32
    %47 = vector.broadcast %c0_i32_13 : i32 to vector<1x8x128xi32>
    %48 = arith.cmpi eq, %46, %47 : vector<1x8x128xi32>
    %49 = vector.shape_cast %45 : vector<2x128xi32> to vector<2x1x128xi32>
    %c1_i32_14 = arith.constant 1 : i32
    %50 = vector.broadcast %c1_i32_14 : i32 to vector<1x8x128xi32>
    %51 = arith.cmpi eq, %46, %50 : vector<1x8x128xi32>
    %52 = vector.shape_cast %25 : vector<2x128xi32> to vector<2x1x128xi32>
    %c2_i32 = arith.constant 2 : i32
    %53 = vector.broadcast %c2_i32 : i32 to vector<1x8x128xi32>
    %54 = arith.cmpi eq, %46, %53 : vector<1x8x128xi32>
    %55 = vector.shape_cast %35 : vector<2x128xi32> to vector<2x1x128xi32>
    %c3_i32 = arith.constant 3 : i32
    %56 = vector.broadcast %c3_i32 : i32 to vector<1x8x128xi32>
    %57 = arith.cmpi eq, %46, %56 : vector<1x8x128xi32>
    %58 = vector.shape_cast %44 : vector<2x128xi32> to vector<2x1x128xi32>
    %c0_i32_15 = arith.constant 0 : i32
    %59 = vector.shape_cast %57 : vector<1x8x128xi1> to vector<1x8x128xi1>
    %60 = vector.broadcast %59 : vector<1x8x128xi1> to vector<2x8x128xi1>
    %61 = vector.shape_cast %58 : vector<2x1x128xi32> to vector<2x1x128xi32>
    %62 = vector.broadcast %61 : vector<2x1x128xi32> to vector<2x8x128xi32>
    %63 = vector.broadcast %c0_i32_15 : i32 to vector<2x8x128xi32>
    %64 = arith.select %60, %62, %63 : vector<2x8x128xi1>, vector<2x8x128xi32>
    %65 = vector.shape_cast %54 : vector<1x8x128xi1> to vector<1x8x128xi1>
    %66 = vector.broadcast %65 : vector<1x8x128xi1> to vector<2x8x128xi1>
    %67 = vector.shape_cast %55 : vector<2x1x128xi32> to vector<2x1x128xi32>
    %68 = vector.broadcast %67 : vector<2x1x128xi32> to vector<2x8x128xi32>
    %69 = arith.select %66, %68, %64 : vector<2x8x128xi1>, vector<2x8x128xi32>
    %70 = vector.shape_cast %51 : vector<1x8x128xi1> to vector<1x8x128xi1>
    %71 = vector.broadcast %70 : vector<1x8x128xi1> to vector<2x8x128xi1>
    %72 = vector.shape_cast %52 : vector<2x1x128xi32> to vector<2x1x128xi32>
    %73 = vector.broadcast %72 : vector<2x1x128xi32> to vector<2x8x128xi32>
    %74 = arith.select %71, %73, %69 : vector<2x8x128xi1>, vector<2x8x128xi32>
    %75 = vector.shape_cast %48 : vector<1x8x128xi1> to vector<1x8x128xi1>
    %76 = vector.broadcast %75 : vector<1x8x128xi1> to vector<2x8x128xi1>
    %77 = vector.shape_cast %49 : vector<2x1x128xi32> to vector<2x1x128xi32>
    %78 = vector.broadcast %77 : vector<2x1x128xi32> to vector<2x8x128xi32>
    %79 = arith.select %76, %78, %74 : vector<2x8x128xi1>, vector<2x8x128xi32>
    %c0_16 = arith.constant 0 : index
    %c0_17 = arith.constant 0 : index
    %c0_18 = arith.constant 0 : index
    %80 = vector.load %arg7[%c0_16, %c0_17, %c0_18] : memref<2x8x128xi32, #tpu.memory_space<vmem>>, vector<2x8x128xi32>
    tpu.vector_store %arg7[%c0_16, %c0_17, %c0_18], %79 {strides = array<i32>} : memref<2x8x128xi32, #tpu.memory_space<vmem>>, vector<2x8x128xi32>,
    return
  }
  func.func @transform_0(%arg0: i32) -> (i32, i32) {
    %c0_i32 = arith.constant 0 : i32
    %c0_i32_0 = arith.constant 0 : i32
    %c0_i32_1 = arith.constant 0 : i32
    return %c0_i32, %c0_i32_0 : i32, i32
  }
  func.func @transform_1(%arg0: i32) -> (i32, i32) {
    %c0_i32 = arith.constant 0 : i32
    %c0_i32_0 = arith.constant 0 : i32
    %c0_i32_1 = arith.constant 0 : i32
    return %c0_i32, %c0_i32_0 : i32, i32
  }
  func.func @transform_2(%arg0: i32) -> (i32, i32) {
    %c0_i32 = arith.constant 0 : i32
    %c0_i32_0 = arith.constant 0 : i32
    %c0_i32_1 = arith.constant 0 : i32
    return %c0_i32, %c0_i32_0 : i32, i32
  }
  func.func @transform_3(%arg0: i32) -> (i32, i32) {
    %c0_i32 = arith.constant 0 : i32
    %c0_i32_0 = arith.constant 0 : i32
    %c0_i32_1 = arith.constant 0 : i32
    return %c0_i32, %c0_i32_0 : i32, i32
  }
  func.func @transform_4(%arg0: i32) -> (i32, i32) {
    %c0_i32 = arith.constant 0 : i32
    %c0_i32_0 = arith.constant 0 : i32
    %c0_i32_1 = arith.constant 0 : i32
    return %c0_i32, %c0_i32_0 : i32, i32
  }
  func.func @transform_5(%arg0: i32) -> (i32, i32) {
    %c0_i32 = arith.constant 0 : i32
    %c0_i32_0 = arith.constant 0 : i32
    %c0_i32_1 = arith.constant 0 : i32
    return %c0_i32, %c0_i32_0 : i32, i32
  }
  func.func @transform_6(%arg0: i32) -> (i32, i32, i32) {
    %c0_i32 = arith.constant 0 : i32
    %c0_i32_0 = arith.constant 0 : i32
    %c0_i32_1 = arith.constant 0 : i32
    %c0_i32_2 = arith.constant 0 : i32
    return %c0_i32, %c0_i32_0, %c0_i32_1 : i32, i32, i32
  }
}

</mosaic_0001>

<bundles_post_ra>
// kernel: deberta_prompt_preprocess.1
= control target key start
LH: loop header
LB: loop body
LE: loop exit
PB: predicated region body
PF: predicated region fallthrough
CT: control target
= control target key end

     0   :  { %v410_v0 = vmov 0   ;;  %vm166_vm0 = vcmask 1041408   ;;  %v26_v17 = vlaneseq  ;;  %vm61_vm1 = vcmask 588800   ;;  %s519_s1 = inlined_call_operand.vmem [shape: s32[26,1], index: 1, kind: input, shape index: {}]   ;;  %s520_s0 = inlined_call_operand.vmem [shape: f32[72,128], index: 0, kind: input, shape index: {}]   ;;  %s521_s4 = inlined_call_operand.vmem [shape: s32[2,1], index: 4, kind: input, shape index: {}]   ;;  %s522_s2 = inlined_call_operand.vmem [shape: f32[2,128], index: 2, kind: input, shape index: {}]   ;;  %s523_s3 = inlined_call_operand.vmem [shape: s32[2,128], index: 3, kind: input, shape index: {}]   ;;  %s524_s6 = inlined_call_operand.vmem [shape: s32[2,8,128], index: 6, kind: output, shape index: {1}]   ;;  %s525_s5 = inlined_call_operand.vmem [shape: f32[26,128], index: 5, kind: output, shape index: {0}]  }
   0x1   :  { %409 = vset.pattern.permute.xlu1 %v410_v0  ;;  %408 = vset.pattern.permute.xlu0 %v410_v0  ;;  %v23_v1 = vld [vmem:[%s519_s1 + $0x8] sm:$0xff]  ;;  %v22_v2 = vld [vmem:[%s519_s1] sm:$0xff]  ;;  %v25_v3 = vld [vmem:[%s519_s1 + $0x18] sm:$0x3]  ;;  %v411_v21 = vmov 0.0  }
   0x2   :  { %32 = vperm.xlu1 %409, %v23_v1   ;;  %29 = vperm.xlu0 %408, %v22_v2   ;;  %v24_v4 = vld [vmem:[%s519_s1 + $0x10] sm:$0xff]  ;;  %v60_v5 = vld [vmem:[%s520_s0 + $0x40] sm:$0xff]  ;;  %v59_v6 = vld [vmem:[%s520_s0 + $0x38] sm:$0xff]  ;;  %v27_v18 = vand.u32 127, %v26_v17  ;;  %v412_v28 = vmov 1966171168  }
   0x3   :  { %361 = vmatprep.subr.mxu0 %v60_v5  ;;  %385 = vmatprep.subr.mxu1 %v60_v5  ;;  %v58_v7 = vld [vmem:[%s520_s0 + $0x30] sm:$0xff]  ;;  %v179_v8 = vld [vmem:[%s521_s4] sm:$0x3]  ;;  %v57_v9 = vld [vmem:[%s520_s0 + $0x28] sm:$0xff]  ;;  %v191_v29 = vunpack.c.l.s4 %v412_v28  ;;  %v188_v30 = vshrl.u32 %v26_v17, 7 }
   0x4   :  { %362 = vmatpush3.msra.mxu0 %v60_v5  ;;  %394 = vmatpush3.msra.mxu1 %v60_v5  ;;  %v56_v10 = vld [vmem:[%s520_s0 + $0x20] sm:$0xff]  ;;  %v55_v11 = vld [vmem:[%s520_s0 + $0x18] sm:$0xff]  ;;  %v54_v12 = vld [vmem:[%s520_s0 + $0x10] sm:$0xff]  ;;  %vm178_vm6 = vcmp.eq.s32.totalorder %v27_v18, 0  ;;  %vm163_vm7 = vcmp.le.s32.totalorder %v27_v18, 4  ;;  %v347_v44 = vadd.s32 4294967291, %v27_v18 }
   0x5   :  { %363 = vmatprep.subr.mxu0 %v59_v6  ;;  %386 = vmatprep.subr.mxu1 %v59_v6  ;;  %v53_v13 = vld [vmem:[%s520_s0 + $0x8] sm:$0xff]  ;;  %v52_v14 = vld [vmem:[%s520_s0] sm:$0xff]  ;;  %v192_v31 = vunpack.c.0.s8 %v191_v29  ;;  %v285_v47 = vsub.s32 0, %v188_v30  ;;  %vm258_vm8 = vcmp.eq.s32.totalorder %v188_v30, 3  ;;  %vm235_vm9 = vcmp.eq.s32.totalorder %v188_v30, 2 }
   0x6   :  { %38 = vperm.xlu1 %409, %v25_v3   ;;  %35 = vperm.xlu0 %408, %v24_v4   ;;  %v164_v15 = vld [vmem:[%s522_s2] sm:$0x3]  ;;  %vm212_vm10 = vcmp.eq.s32.totalorder %v188_v30, 1  ;;  %vm189_vm11 = vcmp.eq.s32.totalorder %v188_v30, 0 }
   0x7   :  { %364 = vmatpush3.msra.mxu0 %v59_v6  ;;  %395 = vmatpush3.msra.mxu1 %v59_v6  ;;  %v167_v16 = vsel %vm166_vm0, %v164_v15, 0.0  ;;  %v165_v33 = vld [vmem:[%s523_s3] sm:$0x3]  ;;  %v195_v34 = vsub.s32 %v192_v31, %v188_v30  ;;  %v173_v37 = vsel %vm163_vm7, 1.0, %v164_v15 }
   0x8   :  { %365 = vmatprep.subr.mxu0 %v58_v7  ;;  %387 = vmatprep.subr.mxu1 %v58_v7  ;;  %v174_v36 = vsel %vm163_vm7, 1, %v165_v33 }
   0x9   :  { %366 = vmatpush3.msra.mxu0 %v58_v7  ;;  %396 = vmatpush3.msra.mxu1 %v58_v7  ;;  %v219_v40 = vrot.slane %v174_v36, %v195_v34  ;;  %v196_v42 = vrot.slane %v173_v37, %v195_v34 }
   0xa   :  { %183 = vperm.xlu1 %409, %v179_v8   ;;  %367 = vmatprep.subr.mxu0 %v57_v9 }
   0xb   :  { %368 = vmatpush3.msra.mxu0 %v57_v9  ;;  %388 = vmatprep.subr.mxu1 %v57_v9  ;;  %v220_v46 = vcombine.high %v219_v40, %v219_v40  ;;  %v197_v50 = vcombine.high %v196_v42, %v196_v42  ;;  %v227_v51 = vrot.slane %v219_v40, %v195_v34 }
   0xc   :  { %369 = vmatprep.subr.mxu0 %v56_v10  ;;  %397 = vmatpush3.msra.mxu1 %v57_v9  ;;  %v204_v54 = vrot.slane %v196_v42, %v195_v34 }
   0xd   :  { %370 = vmatpush3.msra.mxu0 %v56_v10  ;;  %389 = vmatprep.subr.mxu1 %v56_v10  ;;  %v234_v56 = vrot.slane %v220_v46, %v195_v34  ;;  %v211_v58 = vrot.slane %v197_v50, %v195_v34  ;;  %v310_v61 = vrot.slane %v227_v51, %v285_v47 }
   0xe   :  { %371 = vmatprep.subr.mxu0 %v55_v11  ;;  %398 = vmatpush3.msra.mxu1 %v56_v10  ;;  %v322_v63 = vrot.slane %v204_v54, %v285_v47 }
   0xf   :  { %372 = vmatpush3.msra.mxu0 %v55_v11  ;;  %390 = vmatprep.subr.mxu1 %v55_v11  ;;  %v314_v2 = vrot.slane %v234_v56, %v285_v47  ;;  %v326_v4 = vrot.slane %v211_v58, %v285_v47 }
  0x10   :  { %373 = vmatprep.subr.mxu0 %v54_v12  ;;  %399 = vmatpush3.msra.mxu1 %v55_v11 }
  0x11   :  { %374 = vmatpush3.msra.mxu0 %v54_v12  ;;  %391 = vmatprep.subr.mxu1 %v54_v12 }
  0x12   :  { %375 = vmatprep.subr.mxu0 %v53_v13  ;;  %400 = vmatpush3.msra.mxu1 %v54_v12 }
  0x13   :  { %376 = vmatpush3.msra.mxu0 %v53_v13  ;;  %392 = vmatprep.subr.mxu1 %v53_v13 }
  0x14   :  { %377 = vmatprep.subr.mxu0 %v52_v14  ;;  %401 = vmatpush3.msra.mxu1 %v53_v13 }
  0x15   :  { %378 = vmatpush3.msra.mxu0 %v52_v14  ;;  %393 = vmatprep.subr.mxu1 %v52_v14 }
  0x16   :  { %402 = vmatpush3.msra.mxu1 %v52_v14 }
  0x25   :  { %168 = vadd.xlane.f32.xlu0 %v167_v16 }
  0x7d   :  { %v33_v19 = vpop.permute.xlu1 %32  ;;  %v30_v20 = vpop.permute.xlu0 %29 }
  0x7e   :  { %vm41_vm2 = vcmp.eq.s32.totalorder %v33_v19, %v27_v18  ;;  %vm40_vm3 = vcmp.eq.s32.totalorder %v30_v20, %v27_v18 }
  0x7f   :  { %v340_v22 = vsel %vm41_vm2, 1.0, %v411_v21  ;;  %v339_v23 = vsel %vm40_vm3, 1.0, %v411_v21 }
  0x80   :  { %379 = vmatprep.mubr.msk.f32.mxu0 %vm61_vm1, %v339_v23 }
  0x81   :  { %v39_v24 = vpop.permute.xlu1 %38  ;;  %v36_v25 = vpop.permute.xlu0 %35  ;;  %380 = vmatmul.mubr.msk.f32.vlgmr.msra.gmra.mxu0 %vm61_vm1, %v340_v22 }
  0x82   :  { %vm43_vm4 = vcmp.eq.s32.totalorder %v39_v24, %v27_v18  ;;  %vm42_vm5 = vcmp.eq.s32.totalorder %v36_v25, %v27_v18 }
  0x83   :  { %v342_v26 = vsel %vm43_vm4, 1.0, %v411_v21  ;;  %v341_v27 = vsel %vm42_vm5, 1.0, %v411_v21 }
  0x84   :  { %382 = vmatprep.mubr.msk.f32.mxu1 %vm61_vm1, %v341_v27 }
  0x85   :  { %383 = vmatmul.mubr.msk.f32.vlgmr.msra.gmra.mxu1 %vm61_vm1, %v342_v26  ;;  %v184_v32 = vpop.permute.xlu1 %183 }
  0x86   :  { %v185_v35 = vsel %vm178_vm6, %v184_v32, 4294967196 }
  0x87   :  { %v265_v38 = vrot.slane %v185_v35, %v195_v34 }
  0x89   :  { %v266_v43 = vcombine.high %v265_v38, %v265_v38  ;;  %v273_v48 = vrot.slane %v265_v38, %v195_v34 }
  0x8b   :  { %v280_v52 = vrot.slane %v266_v43, %v195_v34  ;;  %v286_v57 = vrot.slane %v273_v48, %v285_v47 }
  0x8d   :  { %v290_v62 = vrot.slane %v280_v52, %v285_v47  ;;  %v291_v3 = vsel %vm258_vm8, %v286_v57, 0 }
  0x8f   :  { %v292_v7 = vsel %vm258_vm8, %v290_v62, 0 }
  0xae   :  { %v169_v39 = vpop.xlane.xlu0 %168 }
  0xaf   :  { %v403_v41 = vtrunc.f32 %v169_v39 }
  0xb1   :  { %v404_v45 = vcvt.f32.s32 %v403_v41 }
  0xb3   :  { %v175_v49 = vadd.s32 %v404_v45, %v27_v18 }
  0xb5   :  { %v177_v53 = vsel %vm163_vm7, %v175_v49, %v347_v44 }
  0xb6   :  { %v242_v55 = vrot.slane %v177_v53, %v195_v34 }
  0xb8   :  { %v243_v59 = vcombine.high %v242_v55, %v242_v55  ;;  %v250_v60 = vrot.slane %v242_v55, %v195_v34 }
  0xba   :  { %v257_v0 = vrot.slane %v243_v59, %v195_v34  ;;  %v298_v1 = vrot.slane %v250_v60, %v285_v47 }
  0xbc   :  { %v302_v5 = vrot.slane %v257_v0, %v285_v47  ;;  %v303_v6 = vsel %vm235_vm9, %v298_v1, %v291_v3 }
  0xbd   :  { %v315_v8 = vsel %vm212_vm10, %v310_v61, %v303_v6 }
  0xbe   :  { %v304_v9 = vsel %vm235_vm9, %v302_v5, %v292_v7  ;;  %v327_v10 = vsel %vm189_vm11, %v322_v63, %v315_v8 }
  0xbf   :  { %v316_v11 = vsel %vm212_vm10, %v314_v2, %v304_v9  ;;  %329 = vst [vmem:[%s524_s6] sm:$0xff] %v327_v10 }
  0xc0   :  { %v328_v12 = vsel %vm189_vm11, %v326_v4, %v316_v11 }
  0xc1   :  { %330 = vst [vmem:[%s524_s6 + $0x8] sm:$0xff] %v328_v12 }
 0x141   :  { %v381_v13 = vpop.f32.mrf.mxu0 }
 0x142   :  { %160 = vst [vmem:[%s525_s5 + $0x8] sm:$0xff] %v381_v13 }
 0x143   :  { %v140_v14 = vpop.f32.mrf.mxu0 }
 0x144   :  { %159 = vst [vmem:[%s525_s5] sm:$0xff] %v140_v14 }
 0x145   :  { %v384_v15 = vpop.f32.mrf.mxu1 }
 0x146   :  { %162 = vst [vmem:[%s525_s5 + $0x18] sm:$0x3] %v384_v15 }
 0x147   :  { %v150_v16 = vpop.f32.mrf.mxu1 }
 0x148   :  { %161 = vst [vmem:[%s525_s5 + $0x10] sm:$0xff] %v150_v16 }

</bundles_post_ra>
